<compile_context>
chip_gen: v7x
topology: tpu7x:2x2x1
jax: 0.10.0
libtpu: 0.0.40
codegen_flags: <defaults>
</compile_context>

<pallas_src>
import functools

import jax
import jax.numpy as jnp
from jax.experimental import pallas as pl
from jax.experimental.pallas import tpu as pltpu


LANE = 128   # pad every feature dim to a multiple of this
TM = 128     # batch rows per grid step (multiple of 8; maps cleanly on v5e/v6e/v7x)


def _round_up(n, m):
    return ((n + m - 1) // m) * m


def mlp_kernel(x_ref, w1_ref, b1_ref, w2_ref, b2_ref, w3_ref, b3_ref, o_ref):
    # layer 1: ReLU(x @ W1 + b1)
    h1 = jnp.dot(x_ref[...], w1_ref[...], preferred_element_type=jnp.float32)
    h1 = jnp.maximum(h1 + b1_ref[...], 0.0)
    # layer 2: ReLU(h1 @ W2 + b2)
    h2 = jnp.dot(h1, w2_ref[...], preferred_element_type=jnp.float32)
    h2 = jnp.maximum(h2 + b2_ref[...], 0.0)
    # layer 3: logits = h2 @ W3 + b3   (no activation)
    logits = jnp.dot(h2, w3_ref[...], preferred_element_type=jnp.float32)
    o_ref[...] = (logits + b3_ref[...]).astype(o_ref.dtype)


@functools.partial(jax.jit, static_argnames=("num_classes",))
def mlp_forward(x, padded_params, num_classes):
    """Fused 3-layer MLP forward.

    x: (B, in_size) float32 (unpadded).
    padded_params: (W1, b1, W2, b2, W3, b3) with every feature dim zero-padded
      to a multiple of 128 and weights stored as (fan_in_p, fan_out_p).
    Returns (B, num_classes) float32 logits.
    """
    w1, b1, w2, b2, w3, b3 = padded_params
    B, in_size = x.shape
    in_p = w1.shape[0]
    nc_p = w3.shape[1]

    # Pad feature dim (zeros hit zero-padded weight rows -> no effect) and pad
    # the batch dim up to a multiple of TM so the grid tiles evenly.
    Bp = _round_up(B, TM)
    x_p = jnp.zeros((Bp, in_p), jnp.float32).at[:B, :in_size].set(x)

    grid = (Bp // TM,)

    resident = lambda arr: pl.BlockSpec(arr.shape, lambda i: (0,) * arr.ndim)

    flops = 2 * Bp * (w1.shape[0] * w1.shape[1]
                      + w2.shape[0] * w2.shape[1]
                      + w3.shape[0] * w3.shape[1])
    bytes_accessed = 4 * (x_p.size + w1.size + b1.size + w2.size + b2.size
                          + w3.size + b3.size + Bp * nc_p)

    out_p = pl.pallas_call(
        mlp_kernel,
        out_shape=jax.ShapeDtypeStruct((Bp, nc_p), jnp.float32),
        grid_spec=pltpu.PrefetchScalarGridSpec(
            num_scalar_prefetch=0,
            grid=grid,
            in_specs=[
                pl.BlockSpec((TM, in_p), lambda i: (i, 0)),  # x: batch-tiled
                resident(w1), resident(b1),                  # weights/biases stay
                resident(w2), resident(b2),                  # VMEM-resident across
                resident(w3), resident(b3),                  # the whole grid
            ],
            out_specs=pl.BlockSpec((TM, nc_p), lambda i: (i, 0)),
        ),
        compiler_params=pltpu.CompilerParams(
            dimension_semantics=("parallel",),               # 2 TCs on v7x
        ),
        cost_estimate=pl.CostEstimate(
            flops=flops, transcendentals=0, bytes_accessed=bytes_accessed),
    )(x_p, w1, b1, w2, b2, w3, b3)

    # Slice away batch + class padding.
    return out_p[:B, :num_classes]


def init_params(key, in_size, h1_size, h2_size, num_classes):
    """Deterministic init mimicking nn.Linear (uniform +-1/sqrt(fan_in)).
    Weights stored as (fan_in, fan_out); biases as (1, fan_out)."""
    ks = jax.random.split(key, 6)

    def linear(kw, kb, fan_in, fan_out):
        bound = 1.0 / jnp.sqrt(fan_in)
        w = jax.random.uniform(kw, (fan_in, fan_out), jnp.float32, -bound, bound)
        b = jax.random.uniform(kb, (1, fan_out), jnp.float32, -bound, bound)
        return w, b

    w1, b1 = linear(ks[0], ks[1], in_size, h1_size)
    w2, b2 = linear(ks[2], ks[3], h1_size, h2_size)
    w3, b3 = linear(ks[4], ks[5], h2_size, num_classes)
    return (w1, b1, w2, b2, w3, b3)


def pad_params(params):
    """Zero-pad every feature dim to a multiple of 128 for lane-dense kernels."""
    w1, b1, w2, b2, w3, b3 = params

    def pad_w(w):
        fi, fo = w.shape
        return jnp.zeros((_round_up(fi, LANE), _round_up(fo, LANE)),
                         w.dtype).at[:fi, :fo].set(w)

    def pad_b(b):
        fo = b.shape[1]
        return jnp.zeros((1, _round_up(fo, LANE)), b.dtype).at[:, :fo].set(b)

    return (pad_w(w1), pad_b(b1), pad_w(w2), pad_b(b2), pad_w(w3), pad_b(b3))


def reference_forward(x, params):
    w1, b1, w2, b2, w3, b3 = params
    h1 = jnp.maximum(x @ w1 + b1, 0.0)
    h2 = jnp.maximum(h1 @ w2 + b2, 0.0)
    return h2 @ w3 + b3


if __name__ == "__main__":
    # Small shapes consistent with the module (in=32, h1=64, h2=32, classes=10).
    # Batch 256 -> 2 grid steps of TM=128 so the pipeline actually engages.
    batch, in_size, h1_size, h2_size, num_classes = 256, 32, 64, 32, 10

    key = jax.random.PRNGKey(0)
    k_x, k_p = jax.random.split(key)
    x = jax.random.normal(k_x, (batch, in_size), jnp.float32)
    params = init_params(k_p, in_size, h1_size, h2_size, num_classes)
    padded = pad_params(params)

    out = mlp_forward(x, padded, num_classes)
    out = jax.block_until_ready(out)

    ref = reference_forward(x, params)
    assert out.shape == (batch, num_classes), out.shape
    assert jnp.allclose(out, ref, atol=1e-5, rtol=1e-5), "mismatch vs reference"

    print("KERNEL_OK")
</pallas_src>

<mosaic_0001>
module attributes {stable_mosaic.version = 11 : i64} {
  func.func @mlp_kernel(%arg0: i32, %arg1: memref<128x128xf32, #tpu.memory_space<vmem>>, %arg2: memref<128x128xf32, #tpu.memory_space<vmem>>, %arg3: memref<1x128xf32, #tpu.memory_space<vmem>>, %arg4: memref<128x128xf32, #tpu.memory_space<vmem>>, %arg5: memref<1x128xf32, #tpu.memory_space<vmem>>, %arg6: memref<128x128xf32, #tpu.memory_space<vmem>>, %arg7: memref<1x128xf32, #tpu.memory_space<vmem>>, %arg8: memref<128x128xf32, #tpu.memory_space<vmem>>) attributes {dimension_semantics = [#tpu.dimension_semantics<parallel>], iteration_bounds = array<i64: 2>, scalar_prefetch = 0 : i64, scratch_operands = 0 : i64, tpu.core_type = #tpu.core_type<tc>, window_params = [{transform_indices = @transform_0, window_bounds = array<i64: 128, 128>}, {pipeline_mode = #tpu.pipeline_mode<synchronous>, transform_indices = @transform_1, window_bounds = array<i64: 128, 128>}, {pipeline_mode = #tpu.pipeline_mode<synchronous>, transform_indices = @transform_2, window_bounds = array<i64: 1, 128>}, {pipeline_mode = #tpu.pipeline_mode<synchronous>, transform_indices = @transform_3, window_bounds = array<i64: 128, 128>}, {pipeline_mode = #tpu.pipeline_mode<synchronous>, transform_indices = @transform_4, window_bounds = array<i64: 1, 128>}, {pipeline_mode = #tpu.pipeline_mode<synchronous>, transform_indices = @transform_5, window_bounds = array<i64: 128, 128>}, {pipeline_mode = #tpu.pipeline_mode<synchronous>, transform_indices = @transform_6, window_bounds = array<i64: 1, 128>}, {transform_indices = @transform_7, window_bounds = array<i64: 128, 128>}]} {
    %c0 = arith.constant 0 : index
    %c0_0 = arith.constant 0 : index
    %0 = vector.load %arg1[%c0, %c0_0] : memref<128x128xf32, #tpu.memory_space<vmem>>, vector<128x128xf32>
    %c0_1 = arith.constant 0 : index
    %c0_2 = arith.constant 0 : index
    %1 = vector.load %arg2[%c0_1, %c0_2] : memref<128x128xf32, #tpu.memory_space<vmem>>, vector<128x128xf32>
    %cst = arith.constant dense<0.000000e+00> : vector<128x128xf32>
    %2 = tpu.matmul %0, %1, %cst {dimension_numbers = #tpu.dot_dimension_numbers<[1], [0], [0], [1], [0, 0, 1, 1], [], []>} : vector<128x128xf32>, vector<128x128xf32>, vector<128x128xf32> -> vector<128x128xf32>
    %c0_3 = arith.constant 0 : index
    %c0_4 = arith.constant 0 : index
    %3 = vector.load %arg3[%c0_3, %c0_4] : memref<1x128xf32, #tpu.memory_space<vmem>>, vector<1x128xf32>
    %4 = vector.broadcast %3 : vector<1x128xf32> to vector<128x128xf32>
    %5 = arith.addf %2, %4 : vector<128x128xf32>
    %cst_5 = arith.constant 0.000000e+00 : f32
    %6 = vector.broadcast %cst_5 : f32 to vector<128x128xf32>
    %7 = arith.maximumf %5, %6 : vector<128x128xf32>
    %c0_6 = arith.constant 0 : index
    %c0_7 = arith.constant 0 : index
    %8 = vector.load %arg4[%c0_6, %c0_7] : memref<128x128xf32, #tpu.memory_space<vmem>>, vector<128x128xf32>
    %cst_8 = arith.constant dense<0.000000e+00> : vector<128x128xf32>
    %9 = tpu.matmul %7, %8, %cst_8 {dimension_numbers = #tpu.dot_dimension_numbers<[1], [0], [0], [1], [0, 0, 1, 1], [], []>} : vector<128x128xf32>, vector<128x128xf32>, vector<128x128xf32> -> vector<128x128xf32>
    %c0_9 = arith.constant 0 : index
    %c0_10 = arith.constant 0 : index
    %10 = vector.load %arg5[%c0_9, %c0_10] : memref<1x128xf32, #tpu.memory_space<vmem>>, vector<1x128xf32>
    %11 = vector.broadcast %10 : vector<1x128xf32> to vector<128x128xf32>
    %12 = arith.addf %9, %11 : vector<128x128xf32>
    %cst_11 = arith.constant 0.000000e+00 : f32
    %13 = vector.broadcast %cst_11 : f32 to vector<128x128xf32>
    %14 = arith.maximumf %12, %13 : vector<128x128xf32>
    %c0_12 = arith.constant 0 : index
    %c0_13 = arith.constant 0 : index
    %15 = vector.load %arg6[%c0_12, %c0_13] : memref<128x128xf32, #tpu.memory_space<vmem>>, vector<128x128xf32>
    %cst_14 = arith.constant dense<0.000000e+00> : vector<128x128xf32>
    %16 = tpu.matmul %14, %15, %cst_14 {dimension_numbers = #tpu.dot_dimension_numbers<[1], [0], [0], [1], [0, 0, 1, 1], [], []>} : vector<128x128xf32>, vector<128x128xf32>, vector<128x128xf32> -> vector<128x128xf32>
    %c0_15 = arith.constant 0 : index
    %c0_16 = arith.constant 0 : index
    %17 = vector.load %arg7[%c0_15, %c0_16] : memref<1x128xf32, #tpu.memory_space<vmem>>, vector<1x128xf32>
    %18 = vector.broadcast %17 : vector<1x128xf32> to vector<128x128xf32>
    %19 = arith.addf %16, %18 : vector<128x128xf32>
    %c0_17 = arith.constant 0 : index
    %c0_18 = arith.constant 0 : index
    %20 = vector.load %arg8[%c0_17, %c0_18] : memref<128x128xf32, #tpu.memory_space<vmem>>, vector<128x128xf32>
    tpu.vector_store %arg8[%c0_17, %c0_18], %19 {strides = array<i32>} : memref<128x128xf32, #tpu.memory_space<vmem>>, vector<128x128xf32>,
    return
  }
  func.func @transform_0(%arg0: i32) -> (i32, i32) {
    %c0_i32 = arith.constant 0 : i32
    %c0_i32_0 = arith.constant 0 : i32
    return %arg0, %c0_i32 : i32, i32
  }
  func.func @transform_1(%arg0: i32) -> (i32, i32) {
    %c0_i32 = arith.constant 0 : i32
    %c0_i32_0 = arith.constant 0 : i32
    %c0_i32_1 = arith.constant 0 : i32
    return %c0_i32, %c0_i32_0 : i32, i32
  }
  func.func @transform_2(%arg0: i32) -> (i32, i32) {
    %c0_i32 = arith.constant 0 : i32
    %c0_i32_0 = arith.constant 0 : i32
    %c0_i32_1 = arith.constant 0 : i32
    return %c0_i32, %c0_i32_0 : i32, i32
  }
  func.func @transform_3(%arg0: i32) -> (i32, i32) {
    %c0_i32 = arith.constant 0 : i32
    %c0_i32_0 = arith.constant 0 : i32
    %c0_i32_1 = arith.constant 0 : i32
    return %c0_i32, %c0_i32_0 : i32, i32
  }
  func.func @transform_4(%arg0: i32) -> (i32, i32) {
    %c0_i32 = arith.constant 0 : i32
    %c0_i32_0 = arith.constant 0 : i32
    %c0_i32_1 = arith.constant 0 : i32
    return %c0_i32, %c0_i32_0 : i32, i32
  }
  func.func @transform_5(%arg0: i32) -> (i32, i32) {
    %c0_i32 = arith.constant 0 : i32
    %c0_i32_0 = arith.constant 0 : i32
    %c0_i32_1 = arith.constant 0 : i32
    return %c0_i32, %c0_i32_0 : i32, i32
  }
  func.func @transform_6(%arg0: i32) -> (i32, i32) {
    %c0_i32 = arith.constant 0 : i32
    %c0_i32_0 = arith.constant 0 : i32
    %c0_i32_1 = arith.constant 0 : i32
    return %c0_i32, %c0_i32_0 : i32, i32
  }
  func.func @transform_7(%arg0: i32) -> (i32, i32) {
    %c0_i32 = arith.constant 0 : i32
    %c0_i32_0 = arith.constant 0 : i32
    return %arg0, %c0_i32 : i32, i32
  }
}

</mosaic_0001>

<bundles_post_ra>
// kernel: mlp_forward.1
= control target key start
LH: loop header
LB: loop body
LE: loop exit
PB: predicated region body
PF: predicated region fallthrough
CT: control target
= control target key end

     0   :  { %s1352_s24 = smov 0   ;;  %s1607_s0 = inlined_call_operand.vmem [shape: f32[256,128], index: 0, kind: input, shape index: {}]   ;;  %s1608_s1 = inlined_call_operand.vmem [shape: f32[128,128], index: 1, kind: input, shape index: {}]   ;;  %s1609_s2 = inlined_call_operand.vmem [shape: f32[1,128], index: 2, kind: input, shape index: {}]   ;;  %s1610_s3 = inlined_call_operand.vmem [shape: f32[128,128], index: 3, kind: input, shape index: {}]   ;;  %s1611_s4 = inlined_call_operand.vmem [shape: f32[1,128], index: 4, kind: input, shape index: {}]   ;;  %s1612_s5 = inlined_call_operand.vmem [shape: f32[128,128], index: 5, kind: input, shape index: {}]   ;;  %s1613_s6 = inlined_call_operand.vmem [shape: f32[1,128], index: 6, kind: input, shape index: {}]   ;;  %s1614_s7 = inlined_call_operand.vmem [shape: f32[256,128], index: 7, kind: output, shape index: {}]  }
   0x1 LB: > { %s906_s25 = sadd.s32 4294967295, %s1310_s24   ;;  %p910_p0 = scmp.ge.s32.totalorder %s1310_s24, 1  ;;  %s1310_s24 = sphi %s1352_s24, %s17_s24  }
   0x2   : > { %p238_p1 = scmp.lt.s32.totalorder %s1310_s24, 3 }
   0x4   : > { %p239_p2 = pnand %p910_p0, %p238_p1 }
   0x5   : > { %v298_v0 = vld [vmem:[%s1608_s1] sm:$0xff] (!%p239_p2)  ;;  %v299_v1 = vld [vmem:[%s1608_s1 + $0x8] sm:$0xff] (!%p239_p2)  ;;  %v300_v2 = vld [vmem:[%s1608_s1 + $0x10] sm:$0xff] (!%p239_p2)  ;;  %s911_s9 = sshll.u32 (!%p239_p2), %s906_s25, 4 }
   0x6   : > { %242 = sbr.rel (%p239_p2) target bundleno = 720 (0x2d0), region = 48  ;;  %v1184_v3 = vpack.c.bf16 (!%p239_p2), %v299_v1, %v298_v0  ;;  %v301_v4 = vld [vmem:[%s1608_s1 + $0x18] sm:$0xff] (!%p239_p2)  ;;  %p271_p3 = scmp.lt.s32.totalorder (!%p239_p2), %s911_s9, 31  ;;  %v302_v6 = vld [vmem:[%s1608_s1 + $0x20] sm:$0xff] (!%p239_p2)  ;;  %v303_v7 = vld [vmem:[%s1608_s1 + $0x28] sm:$0xff] (!%p239_p2) }
   0x7   : > { %v1188_v5 = vpack.c.bf16 (!%p239_p2), %v301_v4, %v300_v2  ;;  %v1192_v8 = vpack.c.bf16 (!%p239_p2), %v303_v7, %v302_v6  ;;  %v304_v9 = vld [vmem:[%s1608_s1 + $0x30] sm:$0xff] (!%p239_p2)  ;;  %v482_v10 = vld [vmem:[%s1610_s3] sm:$0xff] (!%p239_p2)  ;;  %v483_v11 = vld [vmem:[%s1610_s3 + $0x8] sm:$0xff] (!%p239_p2) }
   0x8   : > { %1185 = vmatprep.subr.bf16.mxu0 (!%p239_p2), %v1184_v3  ;;  %v305_v12 = vld [vmem:[%s1608_s1 + $0x38] sm:$0xff] (!%p239_p2)  ;;  %v1216_v13 = vpack.c.bf16 (!%p239_p2), %v483_v11, %v482_v10  ;;  %v484_v14 = vld [vmem:[%s1610_s3 + $0x10] sm:$0xff] (!%p239_p2)  ;;  %v306_v19 = vld [vmem:[%s1608_s1 + $0x40] sm:$0xff] (!%p239_p2) }
   0x9   : > { %1187 = vmatpush3.bf16.msra.mxu0 (!%p239_p2), %v1184_v3  ;;  %v485_v15 = vld [vmem:[%s1610_s3 + $0x18] sm:$0xff] (!%p239_p2)  ;;  %v1196_v18 = vpack.c.bf16 (!%p239_p2), %v305_v12, %v304_v9  ;;  %v307_v20 = vld [vmem:[%s1608_s1 + $0x48] sm:$0xff] (!%p239_p2)  ;;  %v486_v21 = vld [vmem:[%s1610_s3 + $0x20] sm:$0xff] (!%p239_p2) }
   0xa   : > { %1189 = vmatprep.subr.bf16.mxu0 (!%p239_p2), %v1188_v5  ;;  %v1220_v17 = vpack.c.bf16 (!%p239_p2), %v485_v15, %v484_v14  ;;  %1217 = vmatprep.subr.bf16.mxu1 (!%p239_p2), %v1216_v13  ;;  %v487_v22 = vld [vmem:[%s1610_s3 + $0x28] sm:$0xff] (!%p239_p2)  ;;  %v488_v23 = vld [vmem:[%s1610_s3 + $0x30] sm:$0xff] (!%p239_p2)  ;;  %v1200_v24 = vpack.c.bf16 (!%p239_p2), %v307_v20, %v306_v19  ;;  %v489_v26 = vld [vmem:[%s1610_s3 + $0x38] sm:$0xff] (!%p239_p2) }
   0xb   : > { %1219 = vmatpush3.bf16.msra.mxu1 (!%p239_p2), %v1216_v13  ;;  %v1224_v25 = vpack.c.bf16 (!%p239_p2), %v487_v22, %v486_v21  ;;  %v308_v27 = vld [vmem:[%s1608_s1 + $0x50] sm:$0xff] (!%p239_p2)  ;;  %v309_v28 = vld [vmem:[%s1608_s1 + $0x58] sm:$0xff] (!%p239_p2)  ;;  %v1228_v29 = vpack.c.bf16 (!%p239_p2), %v489_v26, %v488_v23  ;;  %v490_v30 = vld [vmem:[%s1610_s3 + $0x40] sm:$0xff] (!%p239_p2) }
   0xc   : > { %1221 = vmatprep.subr.bf16.mxu1 (!%p239_p2), %v1220_v17  ;;  %v491_v31 = vld [vmem:[%s1610_s3 + $0x48] sm:$0xff] (!%p239_p2)  ;;  %v1204_v32 = vpack.c.bf16 (!%p239_p2), %v309_v28, %v308_v27  ;;  %v310_v33 = vld [vmem:[%s1608_s1 + $0x60] sm:$0xff] (!%p239_p2)  ;;  %v492_v36 = vld [vmem:[%s1610_s3 + $0x50] sm:$0xff] (!%p239_p2) }
   0xd   : > { %s1616_s9 = smov (!%p271_p3, %s911_s9), 31  ;;  %1191 = vmatpush3.bf16.msra.mxu0 %v1188_v5  ;;  %v311_v34 = vld [vmem:[%s1608_s1 + $0x68] sm:$0xff]  ;;  %v1232_v35 = vpack.c.bf16 %v491_v31, %v490_v30  ;;  %v493_v37 = vld [vmem:[%s1610_s3 + $0x58] sm:$0xff]  ;;  %v312_v39 = vld [vmem:[%s1608_s1 + $0x70] sm:$0xff] }
   0xe   : > { %s912_s18 = sshll.u32 %s1616_s9, 3  ;;  %1193 = vmatprep.subr.bf16.mxu0 %v1192_v8  ;;  %v1208_v38 = vpack.c.bf16 %v311_v34, %v310_v33  ;;  %v313_v40 = vld [vmem:[%s1608_s1 + $0x78] sm:$0xff]  ;;  %v1236_v41 = vpack.c.bf16 %v493_v37, %v492_v36  ;;  %v494_v42 = vld [vmem:[%s1610_s3 + $0x60] sm:$0xff]  ;;  %v495_v43 = vld [vmem:[%s1610_s3 + $0x68] sm:$0xff] }
   0xf   : > { %s1398_s28 = scalar_lea.vmem %s1607_s0, %s912_s18  ;;  %1223 = vmatpush3.bf16.msra.mxu1 %v1220_v17  ;;  %v1212_v44 = vpack.c.bf16 %v313_v40, %v312_v39  ;;  %v1240_v45 = vpack.c.bf16 %v495_v43, %v494_v42  ;;  %v496_v61 = vld [vmem:[%s1610_s3 + $0x70] sm:$0xff]  ;;  %v497_v62 = vld [vmem:[%s1610_s3 + $0x78] sm:$0xff]  ;;  %v666_v0 = vld [vmem:[%s1612_s5] sm:$0xff]  ;;  %s1586_s13 = scalar_lea.vmem %s1614_s7, %s912_s18 }
  0x10   : > { %v282_v16 = vld [vmem:[%s1398_s28] sm:$0xff]  ;;  %1225 = vmatprep.subr.bf16.mxu1 %v1224_v25  ;;  %v283_v46 = vld [vmem:[%s1398_s28 + $0x8] sm:$0xff]  ;;  %v284_v47 = vld [vmem:[%s1398_s28 + $0x10] sm:$0xff]  ;;  %v1244_v63 = vpack.c.bf16 %v497_v62, %v496_v61 }
  0x11   : > { %1048 = vmatprep.mubr.f32.mxu0 %v282_v16  ;;  %1195 = vmatpush3.bf16.msra.mxu0 %v1192_v8  ;;  %v285_v48 = vld [vmem:[%s1398_s28 + $0x18] sm:$0xff]  ;;  %v286_v49 = vld [vmem:[%s1398_s28 + $0x20] sm:$0xff]  ;;  %v287_v50 = vld [vmem:[%s1398_s28 + $0x28] sm:$0xff] }
  0x12   : > { %1197 = vmatprep.subr.bf16.mxu0 %v1196_v18  ;;  %v288_v51 = vld [vmem:[%s1398_s28 + $0x30] sm:$0xff]  ;;  %v289_v52 = vld [vmem:[%s1398_s28 + $0x38] sm:$0xff]  ;;  %v290_v53 = vld [vmem:[%s1398_s28 + $0x40] sm:$0xff] }
  0x13   : > { %1227 = vmatpush3.bf16.msra.mxu1 %v1224_v25  ;;  %v291_v54 = vld [vmem:[%s1398_s28 + $0x48] sm:$0xff]  ;;  %v292_v55 = vld [vmem:[%s1398_s28 + $0x50] sm:$0xff]  ;;  %v293_v56 = vld [vmem:[%s1398_s28 + $0x58] sm:$0xff] }
  0x14   : > { %1229 = vmatprep.subr.bf16.mxu1 %v1228_v29  ;;  %v294_v57 = vld [vmem:[%s1398_s28 + $0x60] sm:$0xff]  ;;  %v295_v58 = vld [vmem:[%s1398_s28 + $0x68] sm:$0xff]  ;;  %v296_v59 = vld [vmem:[%s1398_s28 + $0x70] sm:$0xff] }
  0x15   : > { %1199 = vmatpush3.bf16.msra.mxu0 %v1196_v18  ;;  %v297_v60 = vld [vmem:[%s1398_s28 + $0x78] sm:$0xff]  ;;  %v667_v1 = vld [vmem:[%s1612_s5 + $0x8] sm:$0xff]  ;;  %v668_v2 = vld [vmem:[%s1612_s5 + $0x10] sm:$0xff] }
  0x16   : > { %1201 = vmatprep.subr.bf16.mxu0 %v1200_v24  ;;  %v1248_v3 = vpack.c.bf16 %v667_v1, %v666_v0  ;;  %v669_v4 = vld [vmem:[%s1612_s5 + $0x18] sm:$0xff]  ;;  %v670_v6 = vld [vmem:[%s1612_s5 + $0x20] sm:$0xff]  ;;  %v671_v7 = vld [vmem:[%s1612_s5 + $0x28] sm:$0xff] }
  0x17   : > { %1231 = vmatpush3.bf16.msra.mxu1 %v1228_v29  ;;  %v1252_v5 = vpack.c.bf16 %v669_v4, %v668_v2  ;;  %v1256_v8 = vpack.c.bf16 %v671_v7, %v670_v6  ;;  %v672_v9 = vld [vmem:[%s1612_s5 + $0x30] sm:$0xff]  ;;  %v673_v10 = vld [vmem:[%s1612_s5 + $0x38] sm:$0xff]  ;;  %v674_v12 = vld [vmem:[%s1612_s5 + $0x40] sm:$0xff] }
  0x18   : > { %1233 = vmatprep.subr.bf16.mxu1 %v1232_v35  ;;  %v1506_v11 = vpack.c.bf16 %v673_v10, %v672_v9  ;;  %v675_v13 = vld [vmem:[%s1612_s5 + $0x48] sm:$0xff]  ;;  %v676_v15 = vld [vmem:[%s1612_s5 + $0x50] sm:$0xff]  ;;  %v677_v16 = vld [vmem:[%s1612_s5 + $0x58] sm:$0xff] }
  0x19   : > { %1203 = vmatpush3.bf16.msra.mxu0 %v1200_v24  ;;  %v1515_v14 = vpack.c.bf16 %v675_v13, %v674_v12  ;;  %v1525_v17 = vpack.c.bf16 %v677_v16, %v676_v15  ;;  %v678_v18 = vld [vmem:[%s1612_s5 + $0x60] sm:$0xff]  ;;  %v679_v19 = vld [vmem:[%s1612_s5 + $0x68] sm:$0xff]  ;;  %v680_v6 = vld [vmem:[%s1612_s5 + $0x70] sm:$0xff] }
  0x1a   : > { %1205 = vmatprep.subr.bf16.mxu0 %v1204_v32  ;;  %v1535_v20 = vpack.c.bf16 %v679_v19, %v678_v18  ;;  %v1543_v21 = vld [vmem:[%s1609_s2] ss:$0 sm:$0xff]  ;;  %v681_v7 = vld [vmem:[%s1612_s5 + $0x78] sm:$0xff] }
  0x1b   : > { %1235 = vmatpush3.bf16.msra.mxu1 %v1232_v35  ;;  %v916_v9 = vld [vmem:[%s1611_s4] ss:$0 sm:$0xff] }
  0x1c   : > { %1237 = vmatprep.subr.bf16.mxu1 %v1236_v41 }
  0x1d   : > { %1207 = vmatpush3.bf16.msra.mxu0 %v1204_v32 }
  0x1e   : > { %1209 = vmatprep.subr.bf16.mxu0 %v1208_v38 }
  0x1f   : > { %1239 = vmatpush3.bf16.msra.mxu1 %v1236_v41 }
  0x20   : > { %1241 = vmatprep.subr.bf16.mxu1 %v1240_v45 }
  0x21   : > { %1211 = vmatpush3.bf16.msra.mxu0 %v1208_v38 }
  0x22   : > { %1213 = vmatprep.subr.bf16.mxu0 %v1212_v44 }
  0x23   : > { %1243 = vmatpush3.bf16.msra.mxu1 %v1240_v45 }
  0x24   : > { %1245 = vmatprep.subr.bf16.mxu1 %v1244_v63 }
  0x25   : > { %1215 = vmatpush3.bf16.msra.mxu0 %v1212_v44 }
  0x26   : > { %1249 = vmatprep.subr.bf16.mxu0 %v1248_v3 }
  0x27   : > { %1247 = vmatpush3.bf16.msra.mxu1 %v1244_v63 }
  0x28   : > { %1049 = vmatmul.mubr.f32.vlgmr.msra.gmra.mrb[0].mxu0 %v283_v46  ;;  %1280 = vmatprep.subr.bf16.mxu1 %v1248_v3 }
  0x29   : > { %1051 = vmatprep.mubr.f32.mxu0 %v284_v47  ;;  %1251 = vmatpush3.bf16.msra.mxu0 %v1248_v3 }
  0x2a   : > { %1253 = vmatprep.subr.bf16.mxu0 %v1252_v5 }
  0x2c   : > { %1052 = vmatmul.mubr.f32.gmra.mrb[2].mxu0 %v285_v48 }
  0x2d   : > { %1054 = vmatprep.mubr.f32.mxu0 %v286_v49  ;;  %1255 = vmatpush3.bf16.msra.mxu0 %v1252_v5 }
  0x2e   : > { %1257 = vmatprep.subr.bf16.mxu0 %v1256_v8 }
  0x30   : > { %1055 = vmatmul.mubr.f32.gmra.mrb[4].mxu0 %v287_v50 }
  0x31   : > { %1057 = vmatprep.mubr.f32.mxu0 %v288_v51  ;;  %1259 = vmatpush3.bf16.msra.mxu0 %v1256_v8 }
  0x32   : > { %1261 = vmatprep.subr.bf16.mxu0 %v1506_v11 }
  0x34   : > { %1058 = vmatmul.mubr.f32.gmra.mrb[6].mxu0 %v289_v52 }
  0x35   : > { %1060 = vmatprep.mubr.f32.mxu0 %v290_v53  ;;  %1263 = vmatpush3.bf16.msra.mxu0 %v1506_v11 }
  0x36   : > { %1265 = vmatprep.subr.bf16.mxu0 %v1515_v14 }
  0x38   : > { %1061 = vmatmul.mubr.f32.gmra.mrb[8].mxu0 %v291_v54 }
  0x39   : > { %1063 = vmatprep.mubr.f32.mxu0 %v292_v55  ;;  %1267 = vmatpush3.bf16.msra.mxu0 %v1515_v14 }
  0x3a   : > { %1269 = vmatprep.subr.bf16.mxu0 %v1525_v17 }
  0x3c   : > { %1064 = vmatmul.mubr.f32.gmra.mrb[10].mxu0 %v293_v56 }
  0x3d   : > { %1066 = vmatprep.mubr.f32.mxu0 %v294_v57  ;;  %1271 = vmatpush3.bf16.msra.mxu0 %v1525_v17 }
  0x3e   : > { %1273 = vmatprep.subr.bf16.mxu0 %v1535_v20 }
  0x40   : > { %1067 = vmatmul.mubr.f32.gmra.mrb[12].mxu0 %v295_v58 }
  0x41   : > { %1069 = vmatprep.mubr.f32.mxu0 %v296_v59  ;;  %1275 = vmatpush3.bf16.msra.mxu0 %v1535_v20 }
  0x44   : > { %1070 = vmatmul.mubr.f32.gmra.mrb[14].mxu0 %v297_v60 }
  0xfb   : > { %v1050_v22 = vpop.f32.mrb[0].mxu0 }
  0xfc   : > { %v393_v23 = vadd.f32 %v1050_v22, %v1543_v21  ;;  %v387_v24 = vpop.f32.mrb[1].mxu0 }
  0xfd   : > { %v388_v25 = vadd.f32 %v1543_v21, %v387_v24 }
  0xfe   : > { %v467_v28 = vmax.f32 %v393_v23, 0.0 }
  0xff   : > { %v1053_v26 = vpop.f32.mrb[2].mxu0  ;;  %v466_v27 = vmax.f32 %v388_v25, 0.0 }
 0x100   : > { %v403_v29 = vadd.f32 %v1053_v26, %v1543_v21  ;;  %v397_v30 = vpop.f32.mrb[3].mxu0 }
 0x101   : > { %v398_v31 = vadd.f32 %v1543_v21, %v397_v30  ;;  %1104 = vmatprep.mubr.f32.mxu1 %v466_v27 }
 0x102   : > { %1105 = vmatmul.mubr.f32.vlgmr.msra.gmra.mrb[0].mxu1 %v467_v28  ;;  %v469_v34 = vmax.f32 %v403_v29, 0.0 }
 0x103   : > { %v468_v32 = vmax.f32 %v398_v31, 0.0  ;;  %v1056_v33 = vpop.f32.mrb[4].mxu0  ;;  %1288 = vmatpush3.bf16.msra.mxu1 %v1248_v3 }
 0x104   : > { %v413_v35 = vadd.f32 %v1056_v33, %v1543_v21  ;;  %v407_v36 = vpop.f32.mrb[5].mxu0  ;;  %1281 = vmatprep.subr.bf16.mxu1 %v1252_v5 }
 0x105   : > { %v408_v37 = vadd.f32 %v1543_v21, %v407_v36  ;;  %1107 = vmatprep.mubr.f32.mxu1 %v468_v32 }
 0x106   : > { %1108 = vmatmul.mubr.f32.gmra.mrb[2].mxu1 %v469_v34  ;;  %v471_v40 = vmax.f32 %v413_v35, 0.0 }
 0x107   : > { %v470_v38 = vmax.f32 %v408_v37, 0.0  ;;  %v1059_v39 = vpop.f32.mrb[6].mxu0  ;;  %1289 = vmatpush3.bf16.msra.mxu1 %v1252_v5 }
 0x108   : > { %v423_v41 = vadd.f32 %v1059_v39, %v1543_v21  ;;  %v417_v42 = vpop.f32.mrb[7].mxu0  ;;  %1282 = vmatprep.subr.bf16.mxu1 %v1256_v8 }
 0x109   : > { %v418_v43 = vadd.f32 %v1543_v21, %v417_v42  ;;  %1110 = vmatprep.mubr.f32.mxu1 %v470_v38 }
 0x10a   : > { %1111 = vmatmul.mubr.f32.gmra.mrb[4].mxu1 %v471_v40  ;;  %v473_v46 = vmax.f32 %v423_v41, 0.0 }
 0x10b   : > { %v472_v44 = vmax.f32 %v418_v43, 0.0  ;;  %v1062_v45 = vpop.f32.mrb[8].mxu0  ;;  %1290 = vmatpush3.bf16.msra.mxu1 %v1256_v8  ;;  %v1276_v8 = vpack.c.bf16 %v681_v7, %v680_v6 }
 0x10c   : > { %v433_v47 = vadd.f32 %v1062_v45, %v1543_v21  ;;  %v427_v48 = vpop.f32.mrb[9].mxu0  ;;  %1283 = vmatprep.subr.bf16.mxu1 %v1506_v11 }
 0x10d   : > { %v428_v49 = vadd.f32 %v1543_v21, %v427_v48  ;;  %1113 = vmatprep.mubr.f32.mxu1 %v472_v44  ;;  %1277 = vmatprep.subr.bf16.mxu0 %v1276_v8 }
 0x10e   : > { %1114 = vmatmul.mubr.f32.gmra.mrb[6].mxu1 %v473_v46  ;;  %v475_v52 = vmax.f32 %v433_v47, 0.0  ;;  %1279 = vmatpush3.bf16.msra.mxu0 %v1276_v8 }
 0x10f   : > { %v474_v50 = vmax.f32 %v428_v49, 0.0  ;;  %v1065_v51 = vpop.f32.mrb[10].mxu0  ;;  %1291 = vmatpush3.bf16.msra.mxu1 %v1506_v11 }
 0x110   : > { %v443_v53 = vadd.f32 %v1065_v51, %v1543_v21  ;;  %v437_v54 = vpop.f32.mrb[11].mxu0  ;;  %1284 = vmatprep.subr.bf16.mxu1 %v1515_v14 }
 0x111   : > { %v438_v55 = vadd.f32 %v1543_v21, %v437_v54  ;;  %1116 = vmatprep.mubr.f32.mxu1 %v474_v50 }
 0x112   : > { %1117 = vmatmul.mubr.f32.gmra.mrb[8].mxu1 %v475_v52  ;;  %v477_v58 = vmax.f32 %v443_v53, 0.0 }
 0x113   : > { %v476_v56 = vmax.f32 %v438_v55, 0.0  ;;  %v1068_v57 = vpop.f32.mrb[12].mxu0  ;;  %1292 = vmatpush3.bf16.msra.mxu1 %v1515_v14 }
 0x114   : > { %v453_v59 = vadd.f32 %v1068_v57, %v1543_v21  ;;  %v447_v60 = vpop.f32.mrb[13].mxu0  ;;  %1285 = vmatprep.subr.bf16.mxu1 %v1525_v17 }
 0x115   : > { %v448_v61 = vadd.f32 %v1543_v21, %v447_v60  ;;  %1119 = vmatprep.mubr.f32.mxu1 %v476_v56 }
 0x116   : > { %1120 = vmatmul.mubr.f32.gmra.mrb[10].mxu1 %v477_v58  ;;  %v479_v0 = vmax.f32 %v453_v59, 0.0  ;;  %v917_v58 = vld [vmem:[%s1613_s6] ss:$0 sm:$0xff] }
 0x117   : > { %v478_v62 = vmax.f32 %v448_v61, 0.0  ;;  %v1071_v63 = vpop.f32.mrb[14].mxu0  ;;  %1293 = vmatpush3.bf16.msra.mxu1 %v1525_v17 }
 0x118   : > { %v463_v1 = vadd.f32 %v1071_v63, %v1543_v21  ;;  %v457_v2 = vpop.f32.mrb[15].mxu0  ;;  %1286 = vmatprep.subr.bf16.mxu1 %v1535_v20 }
 0x119   : > { %v458_v3 = vadd.f32 %v1543_v21, %v457_v2  ;;  %1122 = vmatprep.mubr.f32.mxu1 %v478_v62 }
 0x11a   : > { %1123 = vmatmul.mubr.f32.gmra.mrb[12].mxu1 %v479_v0  ;;  %v481_v5 = vmax.f32 %v463_v1, 0.0 }
 0x11b   : > { %v480_v4 = vmax.f32 %v458_v3, 0.0  ;;  %1294 = vmatpush3.bf16.msra.mxu1 %v1535_v20 }
 0x11c   : > { %1287 = vmatprep.subr.bf16.mxu1 %v1276_v8 }
 0x11d   : > { %1125 = vmatprep.mubr.f32.mxu1 %v480_v4 }
 0x11e   : > { %1126 = vmatmul.mubr.f32.gmra.mrb[14].mxu1 %v481_v5 }
 0x11f   : > { %1295 = vmatpush3.bf16.msra.mxu1 %v1276_v8 }
 0x1d5   : > { %v1106_v10 = vpop.f32.mrb[0].mxu1 }
 0x1d6   : > { %v577_v11 = vadd.f32 %v1106_v10, %v916_v9  ;;  %v571_v12 = vpop.f32.mrb[1].mxu1 }
 0x1d7   : > { %v572_v13 = vadd.f32 %v916_v9, %v571_v12 }
 0x1d8   : > { %v651_v16 = vmax.f32 %v577_v11, 0.0 }
 0x1d9   : > { %v650_v14 = vmax.f32 %v572_v13, 0.0  ;;  %v1109_v15 = vpop.f32.mrb[2].mxu1 }
 0x1da   : > { %v587_v17 = vadd.f32 %v1109_v15, %v916_v9  ;;  %v581_v18 = vpop.f32.mrb[3].mxu1 }
 0x1db   : > { %v582_v19 = vadd.f32 %v916_v9, %v581_v18  ;;  %1160 = vmatprep.mubr.f32.mxu0 %v650_v14 }
 0x1dc   : > { %1161 = vmatmul.mubr.f32.vlgmr.msra.gmra.mrb[16].mxu0 %v651_v16  ;;  %v653_v22 = vmax.f32 %v587_v17, 0.0 }
 0x1dd   : > { %v652_v20 = vmax.f32 %v582_v19, 0.0  ;;  %v1112_v21 = vpop.f32.mrb[4].mxu1 }
 0x1de   : > { %v597_v23 = vadd.f32 %v1112_v21, %v916_v9  ;;  %v591_v24 = vpop.f32.mrb[5].mxu1 }
 0x1df   : > { %v592_v25 = vadd.f32 %v916_v9, %v591_v24  ;;  %1163 = vmatprep.mubr.f32.mxu0 %v652_v20 }
 0x1e0   : > { %1164 = vmatmul.mubr.f32.gmra.mrb[18].mxu0 %v653_v22  ;;  %v655_v28 = vmax.f32 %v597_v23, 0.0 }
 0x1e1   : > { %v654_v26 = vmax.f32 %v592_v25, 0.0  ;;  %v1115_v27 = vpop.f32.mrb[6].mxu1 }
 0x1e2   : > { %v607_v29 = vadd.f32 %v1115_v27, %v916_v9  ;;  %v601_v30 = vpop.f32.mrb[7].mxu1 }
 0x1e3   : > { %v602_v31 = vadd.f32 %v916_v9, %v601_v30  ;;  %1166 = vmatprep.mubr.f32.mxu0 %v654_v26 }
 0x1e4   : > { %1167 = vmatmul.mubr.f32.gmra.mrb[20].mxu0 %v655_v28  ;;  %v657_v34 = vmax.f32 %v607_v29, 0.0 }
 0x1e5   : > { %v656_v32 = vmax.f32 %v602_v31, 0.0  ;;  %v1118_v33 = vpop.f32.mrb[8].mxu1 }
 0x1e6   : > { %v617_v35 = vadd.f32 %v1118_v33, %v916_v9  ;;  %v611_v36 = vpop.f32.mrb[9].mxu1 }
 0x1e7   : > { %v612_v37 = vadd.f32 %v916_v9, %v611_v36  ;;  %1169 = vmatprep.mubr.f32.mxu0 %v656_v32 }
 0x1e8   : > { %1170 = vmatmul.mubr.f32.gmra.mrb[22].mxu0 %v657_v34  ;;  %v659_v40 = vmax.f32 %v617_v35, 0.0 }
 0x1e9   : > { %v658_v38 = vmax.f32 %v612_v37, 0.0  ;;  %v1121_v39 = vpop.f32.mrb[10].mxu1 }
 0x1ea   : > { %v627_v41 = vadd.f32 %v1121_v39, %v916_v9  ;;  %v621_v42 = vpop.f32.mrb[11].mxu1 }
 0x1eb   : > { %v622_v43 = vadd.f32 %v916_v9, %v621_v42  ;;  %1172 = vmatprep.mubr.f32.mxu1 %v658_v38 }
 0x1ec   : > { %1173 = vmatmul.mubr.f32.vlgmr.msra.gmra.mrb[16].mxu1 %v659_v40  ;;  %v661_v46 = vmax.f32 %v627_v41, 0.0 }
 0x1ed   : > { %v660_v44 = vmax.f32 %v622_v43, 0.0  ;;  %v1124_v45 = vpop.f32.mrb[12].mxu1 }
 0x1ee   : > { %v637_v47 = vadd.f32 %v1124_v45, %v916_v9  ;;  %v631_v48 = vpop.f32.mrb[13].mxu1 }
 0x1ef   : > { %v632_v49 = vadd.f32 %v916_v9, %v631_v48  ;;  %1175 = vmatprep.mubr.f32.mxu1 %v660_v44 }
 0x1f0   : > { %1176 = vmatmul.mubr.f32.gmra.mrb[18].mxu1 %v661_v46  ;;  %v663_v52 = vmax.f32 %v637_v47, 0.0 }
 0x1f1   : > { %v662_v50 = vmax.f32 %v632_v49, 0.0  ;;  %v1127_v51 = vpop.f32.mrb[14].mxu1 }
 0x1f2   : > { %v647_v53 = vadd.f32 %v1127_v51, %v916_v9  ;;  %v641_v54 = vpop.f32.mrb[15].mxu1 }
 0x1f3   : > { %v642_v55 = vadd.f32 %v916_v9, %v641_v54  ;;  %1178 = vmatprep.mubr.f32.mxu1 %v662_v50 }
 0x1f4   : > { %1179 = vmatmul.mubr.f32.gmra.mrb[20].mxu1 %v663_v52  ;;  %v665_v57 = vmax.f32 %v647_v53, 0.0 }
 0x1f5   : > { %v664_v56 = vmax.f32 %v642_v55, 0.0 }
 0x1f7   : > { %1181 = vmatprep.mubr.f32.mxu1 %v664_v56 }
 0x1f8   : > { %1182 = vmatmul.mubr.f32.gmra.mrb[22].mxu1 %v665_v57 }
 0x2af   : > { %v1162_v59 = vpop.f32.mrb[16].mxu0 }
 0x2b0   : > { %v761_v60 = vadd.f32 %v1162_v59, %v917_v58  ;;  %v755_v61 = vpop.f32.mrb[17].mxu0 }
 0x2b1   : > { %v756_v62 = vadd.f32 %v917_v58, %v755_v61 }
 0x2b2   : > { %835 = vst [vmem:[%s1586_s13 + $0x8] sm:$0xff] %v761_v60 }
 0x2b3   : > { %834 = vst [vmem:[%s1586_s13] sm:$0xff] %v756_v62  ;;  %v1165_v63 = vpop.f32.mrb[18].mxu0 }
 0x2b4   : > { %v771_v0 = vadd.f32 %v1165_v63, %v917_v58  ;;  %v765_v1 = vpop.f32.mrb[19].mxu0 }
 0x2b5   : > { %v766_v2 = vadd.f32 %v917_v58, %v765_v1 }
 0x2b6   : > { %837 = vst [vmem:[%s1586_s13 + $0x18] sm:$0xff] %v771_v0 }
 0x2b7   : > { %836 = vst [vmem:[%s1586_s13 + $0x10] sm:$0xff] %v766_v2  ;;  %v1168_v3 = vpop.f32.mrb[20].mxu0 }
 0x2b8   : > { %v781_v4 = vadd.f32 %v1168_v3, %v917_v58  ;;  %v775_v5 = vpop.f32.mrb[21].mxu0 }
 0x2b9   : > { %v776_v6 = vadd.f32 %v917_v58, %v775_v5 }
 0x2ba   : > { %839 = vst [vmem:[%s1586_s13 + $0x28] sm:$0xff] %v781_v4 }
 0x2bb   : > { %838 = vst [vmem:[%s1586_s13 + $0x20] sm:$0xff] %v776_v6  ;;  %v1171_v7 = vpop.f32.mrb[22].mxu0 }
 0x2bc   : > { %v791_v8 = vadd.f32 %v1171_v7, %v917_v58  ;;  %v785_v9 = vpop.f32.mrb[23].mxu0 }
 0x2bd   : > { %v786_v10 = vadd.f32 %v917_v58, %v785_v9 }
 0x2be   : > { %841 = vst [vmem:[%s1586_s13 + $0x38] sm:$0xff] %v791_v8 }
 0x2bf   : > { %840 = vst [vmem:[%s1586_s13 + $0x30] sm:$0xff] %v786_v10  ;;  %v1174_v11 = vpop.f32.mrb[16].mxu1 }
 0x2c0   : > { %v801_v12 = vadd.f32 %v1174_v11, %v917_v58  ;;  %v795_v13 = vpop.f32.mrb[17].mxu1 }
 0x2c1   : > { %v796_v14 = vadd.f32 %v917_v58, %v795_v13 }
 0x2c2   : > { %843 = vst [vmem:[%s1586_s13 + $0x48] sm:$0xff] %v801_v12 }
 0x2c3   : > { %842 = vst [vmem:[%s1586_s13 + $0x40] sm:$0xff] %v796_v14  ;;  %v1177_v15 = vpop.f32.mrb[18].mxu1 }
 0x2c4   : > { %v811_v16 = vadd.f32 %v1177_v15, %v917_v58  ;;  %v805_v17 = vpop.f32.mrb[19].mxu1 }
 0x2c5   : > { %v806_v18 = vadd.f32 %v917_v58, %v805_v17 }
 0x2c6   : > { %845 = vst [vmem:[%s1586_s13 + $0x58] sm:$0xff] %v811_v16 }
 0x2c7   : > { %844 = vst [vmem:[%s1586_s13 + $0x50] sm:$0xff] %v806_v18  ;;  %v1180_v19 = vpop.f32.mrb[20].mxu1 }
 0x2c8   : > { %v821_v20 = vadd.f32 %v1180_v19, %v917_v58  ;;  %v815_v21 = vpop.f32.mrb[21].mxu1 }
 0x2c9   : > { %v816_v22 = vadd.f32 %v917_v58, %v815_v21 }
 0x2ca   : > { %847 = vst [vmem:[%s1586_s13 + $0x68] sm:$0xff] %v821_v20 }
 0x2cb   : > { %846 = vst [vmem:[%s1586_s13 + $0x60] sm:$0xff] %v816_v22  ;;  %v1183_v23 = vpop.f32.mrb[22].mxu1 }
 0x2cc   : > { %v831_v24 = vadd.f32 %v1183_v23, %v917_v58  ;;  %v825_v25 = vpop.f32.mrb[23].mxu1 }
 0x2cd   : > { %v826_v26 = vadd.f32 %v917_v58, %v825_v25 }
 0x2ce   : > { %849 = vst [vmem:[%s1586_s13 + $0x78] sm:$0xff] %v831_v24 }
 0x2cf   : > { %848 = vst [vmem:[%s1586_s13 + $0x70] sm:$0xff] %v826_v26 }
 0x2d0 PF: > { %s17_s24 = sadd.s32 1, %s1310_s24  }
 0x2d1   : > { %p14_p4 = scmp.ge.s32.totalorder %s17_s24, 4  }
 0x2d3   :  { %16 = sbr.rel (!%p14_p4) target bundleno = 1 (0x1), region = 78 }

</bundles_post_ra>
